<compile_context>
chip_gen: v5e
topology: v5e:2x2
jax: 0.10.0
libtpu: 0.0.40
codegen_flags: <defaults>
</compile_context>

<pallas_src>
import functools

import jax
import jax.numpy as jnp
from jax.experimental import pallas as pl
from jax.experimental.pallas import tpu as pltpu


def _layernorm_kernel(x_ref, o_ref, *, d_model, eps, alpha, bias):
    """PyTorch-style LayerNormalization over the last dim of a (tm, D) tile."""
    x = x_ref[...].astype(jnp.float32)                          # (tm, D)
    mean = jnp.mean(x, axis=-1, keepdims=True)
    diff = x - mean
    # torch.Tensor.std(dim=-1) is the *unbiased* estimator (ddof=1).
    var = jnp.sum(diff * diff, axis=-1, keepdims=True) * (1.0 / (d_model - 1))
    std = jnp.sqrt(var)
    inv = 1.0 / (std + eps)     # exact divide: kernel is HBM-bound, slack is free
    o_ref[...] = (alpha * (diff * inv) + bias).astype(o_ref.dtype)


def layer_norm(x, alpha=1.0, bias=0.0, *, eps=1e-6, donate_input=False):
    """LayerNormalization(eps) with scalar alpha/bias, fused in one kernel.

    x: (..., d_model). Rows (= product of leading dims) are tiled over a 1-D
    parallel grid; d_model stays whole in the lane dimension. No host-side
    pad/slice: the ragged last tile (if any) is masked by Pallas on write-back.
    """
    orig_shape = x.shape
    d_model = int(orig_shape[-1])
    assert d_model >= 2, "unbiased std (ddof=1) requires d_model >= 2"
    rows = 1
    for d in orig_shape[:-1]:
        rows *= int(d)
    x2 = x.reshape(rows, d_model)

    itemsize = jnp.dtype(x.dtype).itemsize
    # Sublane packing multiple: f32 -> 8, bf16 -> 16, int8/fp8 -> 32.
    pack = max(8, 32 // itemsize)

    # Tile sized by bytes: ~2 MiB of f32 working set per block amortizes the
    # ~0.35 us per-grid-step pipeline overhead while staying far under the
    # VMEM limit on every generation (v5e/v6e/v7x).
    target_rows = max(pack, (2 * 1024 * 1024) // (4 * d_model))
    tm = max(pack, (target_rows // pack) * pack)
    # Keep >= 8 grid steps when there is enough data so v7x's 2 TensorCores
    # both get work ("parallel" grid axis). v5e/v6e (1 TC) are unaffected.
    if rows >= 8 * pack:
        tm = min(tm, max(pack, ((rows // 8) // pack) * pack))
    # Tiny inputs: a single (possibly ragged) tile rounded up to the pack size.
    tm = min(tm, ((rows + pack - 1) // pack) * pack)

    grid = (pl.cdiv(rows, tm),)

    kernel = functools.partial(
        _layernorm_kernel,
        d_model=d_model, eps=float(eps), alpha=float(alpha), bias=float(bias))

    cost = pl.CostEstimate(
        flops=8 * rows * d_model,
        transcendentals=2 * rows,                 # sqrt + divide per row
        bytes_accessed=2 * rows * d_model * itemsize,
    )

    out = pl.pallas_call(
        kernel,
        out_shape=jax.ShapeDtypeStruct((rows, d_model), x.dtype),
        grid=grid,
        in_specs=[pl.BlockSpec((tm, d_model), lambda i: (i, 0))],
        out_specs=pl.BlockSpec((tm, d_model), lambda i: (i, 0)),
        compiler_params=pltpu.CompilerParams(
            dimension_semantics=("parallel",),     # rows independent
            vmem_limit_bytes=32 * 1024 * 1024,     # explicit budget: safe on 64 MiB v7x
        ),
        cost_estimate=cost,
        input_output_aliases=({0: 0} if donate_input else {}),
    )(x2)

    return out.reshape(orig_shape)


def encoder_forward(x, mask, layers=(), *, alpha=1.0, bias=0.0, eps=1e-6,
                    donate_input=False):
    """Encoder.forward: apply each layer(x, mask), then LayerNormalization."""
    # TODO(synk): the EncoderBlock layers inside nn.ModuleList are not defined
    # in the provided spec; they are taken as user-supplied JAX callables
    # (x, mask) -> x and applied here, outside the Pallas kernel.
    for layer in layers:
        x = layer(x, mask)
    return layer_norm(x, alpha=alpha, bias=bias, eps=eps,
                      donate_input=donate_input)


def _layer_norm_ref(v, alpha=1.0, bias=0.0, eps=1e-6):
    """Pure-JAX reference with PyTorch semantics (unbiased std, eps on std)."""
    mean = jnp.mean(v, axis=-1, keepdims=True)
    std = jnp.std(v, axis=-1, keepdims=True, ddof=1)
    return alpha * (v - mean) / (std + eps) + bias


if __name__ == "__main__":
    # Small shapes consistent with the module: batch=2, seq=8, d_model=128.
    B, S, D = 2, 8, 128
    key = jax.random.PRNGKey(0)
    x = jax.random.normal(key, (B, S, D), dtype=jnp.float32)
    mask = jnp.ones((B, 1, 1, S), dtype=jnp.float32)

    # The spec leaves the encoder layers abstract; identity callables exercise
    # the layer loop deterministically.
    layers = [lambda h, m: h, lambda h, m: h]

    out = encoder_forward(x, mask, layers, alpha=1.0, bias=0.0)
    jax.block_until_ready(out)

    ref = _layer_norm_ref(x)
    assert out.shape == x.shape and out.dtype == x.dtype
    # Exact arithmetic in the kernel now (no approx reciprocal) -> tight tol.
    assert jnp.allclose(out, ref, atol=1e-4, rtol=1e-4), float(
        jnp.max(jnp.abs(out - ref)))

    # Ragged-rows path: rows (= 3*7 = 21) is not a multiple of the tile; the
    # last (only) tile extends past the array and Pallas masks its write-back.
    x_rag = jax.random.normal(jax.random.PRNGKey(1), (3, 7, 256), dtype=jnp.float32)
    out_rag = layer_norm(x_rag)
    jax.block_until_ready(out_rag)
    assert jnp.allclose(out_rag, _layer_norm_ref(x_rag), atol=1e-4, rtol=1e-4), float(
        jnp.max(jnp.abs(out_rag - _layer_norm_ref(x_rag))))

    print("KERNEL_OK")
</pallas_src>

<mosaic_0001>
module attributes {stable_mosaic.version = 11 : i64} {
  func.func @_layernorm_kernel(%arg0: i32, %arg1: memref<16x128xf32, #tpu.memory_space<vmem>>, %arg2: memref<16x128xf32, #tpu.memory_space<vmem>>) attributes {dimension_semantics = [#tpu.dimension_semantics<parallel>], iteration_bounds = array<i64: 1>, scalar_prefetch = 0 : i64, scratch_operands = 0 : i64, tpu.core_type = #tpu.core_type<tc>, window_params = [{transform_indices = @transform_0, window_bounds = array<i64: 16, 128>}, {transform_indices = @transform_1, window_bounds = array<i64: 16, 128>}]} {
    %c0 = arith.constant 0 : index
    %c0_0 = arith.constant 0 : index
    %0 = vector.load %arg1[%c0, %c0_0] : memref<16x128xf32, #tpu.memory_space<vmem>>, vector<16x128xf32>
    %cst = arith.constant dense<0.000000e+00> : vector<16xf32>
    %1 = vector.multi_reduction <add>, %0, %cst [1] : vector<16x128xf32> to vector<16xf32>
    %2 = vector.shape_cast %1 : vector<16xf32> to vector<16x1xf32>
    %cst_1 = arith.constant 1.280000e+02 : f32
    %3 = vector.broadcast %cst_1 : f32 to vector<16x1xf32>
    %4 = arith.divf %2, %3 : vector<16x1xf32>
    %5 = vector.broadcast %4 : vector<16x1xf32> to vector<16x128xf32>
    %6 = arith.subf %0, %5 : vector<16x128xf32>
    %7 = arith.mulf %6, %6 : vector<16x128xf32>
    %cst_2 = arith.constant dense<0.000000e+00> : vector<16xf32>
    %8 = vector.multi_reduction <add>, %7, %cst_2 [1] : vector<16x128xf32> to vector<16xf32>
    %9 = vector.shape_cast %8 : vector<16xf32> to vector<16x1xf32>
    %cst_3 = arith.constant 0.00787401571 : f32
    %10 = vector.broadcast %cst_3 : f32 to vector<16x1xf32>
    %11 = arith.mulf %9, %10 : vector<16x1xf32>
    %12 = math.sqrt %11 : vector<16x1xf32>
    %cst_4 = arith.constant 9.99999997E-7 : f32
    %13 = vector.broadcast %cst_4 : f32 to vector<16x1xf32>
    %14 = arith.addf %12, %13 : vector<16x1xf32>
    %cst_5 = arith.constant 1.000000e+00 : f32
    %15 = vector.broadcast %cst_5 : f32 to vector<16x1xf32>
    %16 = arith.divf %15, %14 : vector<16x1xf32>
    %17 = vector.broadcast %16 : vector<16x1xf32> to vector<16x128xf32>
    %18 = arith.mulf %6, %17 : vector<16x128xf32>
    %cst_6 = arith.constant 1.000000e+00 : f32
    %19 = vector.broadcast %cst_6 : f32 to vector<16x128xf32>
    %20 = arith.mulf %19, %18 : vector<16x128xf32>
    %cst_7 = arith.constant 0.000000e+00 : f32
    %21 = vector.broadcast %cst_7 : f32 to vector<16x128xf32>
    %22 = arith.addf %20, %21 : vector<16x128xf32>
    %c0_8 = arith.constant 0 : index
    %c0_9 = arith.constant 0 : index
    %23 = vector.load %arg2[%c0_8, %c0_9] : memref<16x128xf32, #tpu.memory_space<vmem>>, vector<16x128xf32>
    tpu.vector_store %arg2[%c0_8, %c0_9], %22 {strides = array<i32>} : memref<16x128xf32, #tpu.memory_space<vmem>>, vector<16x128xf32>,
    return
  }
  func.func @transform_0(%arg0: i32) -> (i32, i32) {
    %c0_i32 = arith.constant 0 : i32
    %c0_i32_0 = arith.constant 0 : i32
    return %arg0, %c0_i32 : i32, i32
  }
  func.func @transform_1(%arg0: i32) -> (i32, i32) {
    %c0_i32 = arith.constant 0 : i32
    %c0_i32_0 = arith.constant 0 : i32
    return %arg0, %c0_i32 : i32, i32
  }
}

</mosaic_0001>

<bundles_post_ra>
// kernel: tpu_custom_call.1
= control target key start
LH: loop header
LB: loop body
LE: loop exit
PB: predicated region body
PF: predicated region fallthrough
CT: control target
= control target key end

     0   :  { %6 = vsyncpa [#allocation3], 0  ;;  %s230_s0 = inlined_call_operand.hbm [shape: f32[16,128], index: 0, kind: input, shape index: {}]   ;;  %s231_s1 = inlined_call_operand.hbm [shape: f32[16,128], index: 1, kind: output, shape index: {}]  }
   0x1   :  { %7 = vsyncpa [#allocation4], 0  ;;  %s12_s8 = sshll.u32 %s230_s0, 4  ;;  %s198_s9 = smov [#allocation2]   ;;  %s13_s8 = int_to_ptr.hbm [resolvable:$true] %s12_s8 }
   0x2   :  { %s14_s10 = sshll.u32 %s198_s9, 4  ;;  %s199_s11 = smov 128   ;;  %s15_s10 = int_to_ptr.vmem [resolvable:$true] %s14_s10 }
   0x3   :  { %s200_s12 = smov 8  }
   0x4   :  { %20 = dma.hbm_to_vmem [thread:$0]  %s13_s8, 256, %s15_s10, [#allocation3], %s199_s11, %s199_s11, %s200_s12  }
   0x5   :  { %194 = dma.done.wait [#allocation3], 256  }
   0x6   :  { %195 = vsyncadd [#allocation3], 4294967040  ;;  %v25_v0 = vld [vmem:[#allocation2] sm:$0xff]  ;;  %v26_v1 = vld [vmem:[#allocation2 + $0x8] sm:$0xff]  ;;  %v201_v2 = vmov 128.0   ;;  %s202_s0 = smov [#allocation5]  }
   0x7   :  { %27 = vadd.xlane.f32.xlu0 %v25_v0  ;;  %136 = vrcp.f32 %v201_v2  ;;  %s116_s13 = sshll.u32 %s202_s0, 4  ;;  %s118_s16 = sshll.u32 %s231_s1, 4  ;;  %s117_s13 = int_to_ptr.vmem [resolvable:$true] %s116_s13  ;;  %s119_s16 = int_to_ptr.hbm [resolvable:$true] %s118_s16 }
   0xd   :  { %v137_v3 = vpop.eup %136 }
   0xe   :  { %v32_v4 = vmul.f32 128.0, %v137_v3  ;;  %vm36_vm0 = vweird.f32 %v137_v3 }
   0xf   :  { %29 = vadd.xlane.f32.xlu0 %v26_v1 }
  0x10   :  { %v33_v5 = vsub.f32 1.0, %v32_v4 }
  0x12   :  { %v34_v6 = vmul.f32 %v137_v3, %v33_v5 }
  0x14   :  { %v35_v7 = vadd.f32 %v137_v3, %v34_v6 }
  0x16   :  { %v37_v8 = vsel %vm36_vm0, %v137_v3, %v35_v7 }
  0x7a   :  { %v28_v9 = vpop.xlane.xlu0 %27 }
  0x7b   :  { %v38_v10 = vmul.f32 %v37_v8, %v28_v9 }
  0x7d   :  { %v40_v11 = vsub.f32 %v25_v0, %v38_v10 }
  0x7f   :  { %v42_v12 = vmul.f32 %v40_v11, %v40_v11 }
  0x81   :  { %44 = vadd.xlane.f32.xlu1 %v42_v12 }
  0x82   :  { %v30_v13 = vpop.xlane.xlu0 %29 }
  0x83   :  { %v39_v14 = vmul.f32 %v37_v8, %v30_v13 }
  0x85   :  { %v219_v15 = vsub.f32 %v26_v1, %v39_v14 }
  0x87   :  { %v43_v16 = vmul.f32 %v219_v15, %v219_v15 }
  0x89   :  { %46 = vadd.xlane.f32.xlu1 %v43_v16 }
  0xf4   :  { %v45_v17 = vpop.xlane.xlu1 %44 }
  0xf5   :  { %v48_v18 = vmul.f32 0.007874016, %v45_v17 }
  0xf7   :  { %138 = vrsqrt.f32 %v48_v18  ;;  %vm57_vm1 = vcmp.eq.f32.partialorder %v48_v18, inf  ;;  %v60_v31 = vand.u32 2147483648, %v48_v18  ;;  %vm59_vm2 = vcmp.eq.f32.partialorder %v48_v18, 0.0 }
  0xfc   :  { %v47_v19 = vpop.xlane.xlu1 %46 }
  0xfd   :  { %v139_v20 = vpop.eup %138  ;;  %v49_v21 = vmul.f32 0.007874016, %v47_v19 }
  0xfe   :  { %v51_v22 = vmul.f32 %v139_v20, %v48_v18 }
  0xff   :  { %140 = vrsqrt.f32 %v49_v21  ;;  %vm69_vm3 = vcmp.eq.f32.partialorder %v49_v21, inf  ;;  %v72_v39 = vand.u32 2147483648, %v49_v21  ;;  %vm71_vm4 = vcmp.eq.f32.partialorder %v49_v21, 0.0 }
 0x100   :  { %v52_v23 = vmul.f32 %v139_v20, %v51_v22 }
 0x102   :  { %v53_v24 = vmul.f32 0.5, %v52_v23 }
 0x104   :  { %v54_v25 = vsub.f32 1.5, %v53_v24 }
 0x105   :  { %v141_v26 = vpop.eup %140 }
 0x106   :  { %v55_v27 = vmul.f32 %v139_v20, %v54_v25  ;;  %v63_v28 = vmul.f32 %v141_v26, %v49_v21 }
 0x108   :  { %v56_v29 = vmul.f32 %v55_v27, %v48_v18  ;;  %v64_v30 = vmul.f32 %v141_v26, %v63_v28 }
 0x10a   :  { %v58_v32 = vsel %vm57_vm1, %v48_v18, %v56_v29  ;;  %v65_v33 = vmul.f32 0.5, %v64_v30 }
 0x10b   :  { %v61_v34 = vsel %vm59_vm2, %v60_v31, %v58_v32 }
 0x10c   :  { %v66_v35 = vsub.f32 1.5, %v65_v33  ;;  %v74_v36 = vadd.f32 1e-06, %v61_v34 }
 0x10e   :  { %v67_v37 = vmul.f32 %v141_v26, %v66_v35  ;;  %142 = vrcp.f32 %v74_v36  ;;  %v87_v46 = vand.u32 2147483648, %v74_v36  ;;  %v85_v48 = vand.u32 2147483647, %v74_v36 }
 0x10f   :  { %vm81_vm6 = vweird.f32 %v74_v36 }
 0x110   :  { %v68_v38 = vmul.f32 %v67_v37, %v49_v21  ;;  %v88_v51 = vor.u32 1.1754944e-38, %v87_v46  ;;  %vm86_vm8 = vcmp.eq.f32.partialorder %v85_v48, 8.507059e+37 }
 0x112   :  { %v70_v40 = vsel %vm69_vm3, %v49_v21, %v68_v38 }
 0x113   :  { %v73_v41 = vsel %vm71_vm4, %v72_v39, %v70_v40 }
 0x114   :  { %v143_v42 = vpop.eup %142  ;;  %v75_v43 = vadd.f32 1e-06, %v73_v41 }
 0x115   :  { %v77_v44 = vmul.f32 %v143_v42, %v74_v36  ;;  %vm82_vm5 = vweird.f32 %v143_v42 }
 0x116   :  { %144 = vrcp.f32 %v75_v43  ;;  %vm83_vm7 = vmor %vm81_vm6, %vm82_vm5  ;;  %v102_v57 = vand.u32 2147483648, %v75_v43  ;;  %v100_v59 = vand.u32 2147483647, %v75_v43  ;;  %vm96_vm10 = vweird.f32 %v75_v43 }
 0x117   :  { %v78_v45 = vsub.f32 1.0, %v77_v44 }
 0x118   :  { %v103_v61 = vor.u32 1.1754944e-38, %v102_v57  ;;  %vm101_vm12 = vcmp.eq.f32.partialorder %v100_v59, 8.507059e+37 }
 0x119   :  { %v79_v47 = vmul.f32 %v143_v42, %v78_v45 }
 0x11b   :  { %v80_v49 = vadd.f32 %v143_v42, %v79_v47 }
 0x11c   :  { %v145_v50 = vpop.eup %144 }
 0x11d   :  { %v84_v52 = vsel %vm83_vm7, %v143_v42, %v80_v49  ;;  %v92_v53 = vmul.f32 %v145_v50, %v75_v43  ;;  %vm97_vm9 = vweird.f32 %v145_v50 }
 0x11e   :  { %v89_v54 = vsel %vm86_vm8, %v88_v51, %v84_v52  ;;  %vm98_vm11 = vmor %vm96_vm10, %vm97_vm9 }
 0x11f   :  { %v93_v55 = vsub.f32 1.0, %v92_v53  ;;  %v106_v56 = vmul.f32 %v89_v54, %v40_v11 }
 0x121   :  { %v94_v58 = vmul.f32 %v145_v50, %v93_v55  ;;  %110 = vst [vmem:[#allocation5] sm:$0xff] %v106_v56 }
 0x123   :  { %v95_v60 = vadd.f32 %v145_v50, %v94_v58 }
 0x125   :  { %v99_v62 = vsel %vm98_vm11, %v145_v50, %v95_v60 }
 0x126   :  { %v104_v63 = vsel %vm101_vm12, %v103_v61, %v99_v62 }
 0x127   :  { %v107_v0 = vmul.f32 %v104_v63, %v219_v15 }
 0x129   :  { %111 = vst [vmem:[#allocation5 + $0x8] sm:$0xff] %v107_v0 }
 0x12a   :  { %124 = dma.vmem_to_hbm [thread:$0]  %s117_s13, 256, %s119_s16, [#allocation4], %s199_s11, %s199_s11, %s200_s12  }
 0x12b   :  { %196 = dma.done.wait [#allocation4], 256  }
 0x12c   :  { %197 = vsyncadd [#allocation4], 4294967040 }
 0x12d   :  { %129 = vsyncpa [#allocation3], 1 }
 0x12e   :  { %130 = vsyncpa [#allocation4], 1 }

</bundles_post_ra>
